<compile_context>
chip_gen: v7x
topology: tpu7x:2x2x1
jax: 0.10.0
libtpu: 0.0.40
codegen_flags: <defaults>
</compile_context>

<pallas_src>
import functools
from types import SimpleNamespace

import numpy as np
import jax
import jax.numpy as jnp
from jax.experimental import pallas as pl
from jax.experimental.pallas import tpu as pltpu


# ----------------------------------------------------------------------------
# Hardware / tiling helpers
# ----------------------------------------------------------------------------
def _round_up(x, m):
    return ((x + m - 1) // m) * m


def _num_tensorcores():
    """Best-effort TensorCore count of the local chip (v5e/v6e: 1, v7x: 2).
    Only used to decide whether splitting a row axis into >=2 grid steps can
    buy megacore sharding; falls back to 1 (single biggest tile) if unknown."""
    try:
        dev = jax.devices()[0]
        kind = (getattr(dev, "device_kind", "") or "").lower()
        if "v7" in kind:
            return 2
        nc = getattr(dev, "num_cores", None)
        if nc:
            return max(1, int(nc))
    except Exception:
        pass
    return 1


_NUM_TENSORCORES = _num_tensorcores()
# Explicit scoped-VMEM budget: well above the ~8 MiB double-buffered footprint
# of the biggest blocks used here, and safe on v7x (64 MiB physical) as well as
# v5e/v6e (128 MiB physical).
_VMEM_LIMIT_BYTES = 32 * 1024 * 1024


def _pick_tile(n, max_tile, min_tile=256):
    """Row-tile heuristic.

    Single-TC chips (v5e/v6e): the grid is a serial loop, so use the single
    largest block that fits -- halving only doubles the ~0.35us/step overhead
    and shortens the MXU M dim. Multi-TC chips (v7x): keep >=2 grid steps when
    n is large enough so the 'parallel' axis can shard across TensorCores."""
    n = max(int(n), 8)
    n_pad = _round_up(n, 8)
    max_tile = max(_round_up(max_tile, 8), 8)
    if n_pad > max_tile:
        return max_tile
    if _NUM_TENSORCORES >= 2 and n_pad > 2 * min_tile:
        return max(min_tile, _round_up(-(-n_pad // 2), 8))
    return n_pad


# ----------------------------------------------------------------------------
# Pallas kernels
# ----------------------------------------------------------------------------
def _occ_mask_kernel(gv_ref, cv_ref, o_ref, *, n_groups, group):
    """mask[v] = any((global[v] != 0) | (current[v] != 0)) over channels.

    Inputs are repacked in the wrapper so each row carries `n_groups` voxels at
    the full 128-lane width (C=32 -> 4 voxels/row): 4x fewer vld/VPU ops for
    the same HBM bytes. One int32 flag per voxel is written, so the output
    block is `n_groups`x denser than a (tile, 1) column."""
    occ = (gv_ref[...] != 0.0) | (cv_ref[...] != 0.0)      # (T, n_groups*group)
    for g in range(n_groups):
        o_ref[:, g:g + 1] = jnp.any(
            occ[:, g * group:(g + 1) * group], axis=-1, keepdims=True
        ).astype(jnp.int32)


def convgru_kernel(h_ref, x_ref, wh_ref, wx_ref, b_ref, o_ref):
    """ConvGRU update (pointwise-conv gates) on a tile of points.

    Weights are stacked per gate: wh/wx are (3, C, C) bf16 with index
    0 -> z, 1 -> r, 2 -> q; biases b are (3, C) f32. Each matmul result is
    lane-aligned at 0 (no lane-offset slices of fused/packed results), MXU
    operands are bf16 with f32 accumulation, gate math runs in f32.
    sigmoid(x) is computed as 0.5*tanh(0.5*x)+0.5 so the z/r paths cost one
    EUP op per element instead of exp + reciprocal.

      z  = sigmoid(h @ Wz_h + x @ Wz_x + b_z)
      r  = sigmoid(h @ Wr_h + x @ Wr_x + b_r)
      q  = tanh((r*h) @ Wq_h + x @ Wq_x + b_q)
      h' = (1 - z) * h + z * q
    """
    h = h_ref[...]                      # f32 (T, C)
    x = x_ref[...]                      # f32 (T, C)
    hb = h.astype(jnp.bfloat16)
    xb = x.astype(jnp.bfloat16)

    def mm(a, w):
        return jnp.dot(a, w, preferred_element_type=jnp.float32)

    s_z = mm(hb, wh_ref[0]) + mm(xb, wx_ref[0]) + b_ref[0:1, :]
    s_r = mm(hb, wh_ref[1]) + mm(xb, wx_ref[1]) + b_ref[1:2, :]
    z = 0.5 * jnp.tanh(0.5 * s_z) + 0.5        # == sigmoid(s_z), single EUP op
    r = 0.5 * jnp.tanh(0.5 * s_r) + 0.5        # == sigmoid(s_r)

    rh = (r * h).astype(jnp.bfloat16)
    q = jnp.tanh(mm(rh, wh_ref[2]) + mm(xb, wx_ref[2]) + b_ref[2:3, :])

    o_ref[...] = ((1.0 - z) * h + z * q).astype(o_ref.dtype)


# ----------------------------------------------------------------------------
# Pallas wrappers (ragged last block handled by Pallas, no pad/slice round trips)
# ----------------------------------------------------------------------------
def occupancy_mask(global_vol, current_vol, block_bytes=2 << 20):
    """global_vol/current_vol: (V, C) float32 -> (V,) bool occupancy mask."""
    V, C = global_vol.shape
    # Repack to full 128-lane rows when the row-major layout allows it.
    if C < 128 and 128 % C == 0 and (V * C) % 128 == 0:
        n_groups = 128 // C
        width = 128
        gv = global_vol.reshape(V // n_groups, width)      # free, contiguous
        cv = current_vol.reshape(V // n_groups, width)
    else:
        n_groups = 1
        width = C
        gv, cv = global_vol, current_vol

    rows = gv.shape[0]
    # ~2 MiB f32 per input per block -> near HBM-roofline, double-buffered
    # footprint ~8 MiB (fits the explicit 32 MiB scoped-VMEM budget).
    max_tile = max(512, block_bytes // (width * 4))
    tile = _pick_tile(rows, max_tile=max_tile, min_tile=512)
    grid = -(-rows // tile)

    kernel = functools.partial(_occ_mask_kernel, n_groups=n_groups, group=C)
    out = pl.pallas_call(
        kernel,
        out_shape=jax.ShapeDtypeStruct((rows, n_groups), jnp.int32),
        grid=(grid,),
        in_specs=[
            pl.BlockSpec((tile, width), lambda i: (i, 0)),
            pl.BlockSpec((tile, width), lambda i: (i, 0)),
        ],
        out_specs=pl.BlockSpec((tile, n_groups), lambda i: (i, 0)),
        compiler_params=pltpu.CompilerParams(
            dimension_semantics=("parallel",),
            vmem_limit_bytes=_VMEM_LIMIT_BYTES),
    )(gv, cv)
    # (rows, n_groups) row-major flatten == voxel order; bool keeps the host
    # transfer of the mask at 1 B/voxel.
    return out.reshape(-1) != 0


def convgru_fuse(h, x, params, max_tile=2048):
    """h, x: (N, C) float32 point features -> fused (N, C) float32."""
    N, C = h.shape
    if N == 0:
        return jnp.zeros((0, C), jnp.float32)
    tile = _pick_tile(N, max_tile=max_tile, min_tile=256)
    grid = -(-N // tile)
    return pl.pallas_call(
        convgru_kernel,
        out_shape=jax.ShapeDtypeStruct((N, C), jnp.float32),
        grid=(grid,),
        in_specs=[
            pl.BlockSpec((tile, C), lambda i: (i, 0)),        # h
            pl.BlockSpec((tile, C), lambda i: (i, 0)),        # x
            pl.BlockSpec((3, C, C), lambda i: (0, 0, 0)),     # w_h (resident)
            pl.BlockSpec((3, C, C), lambda i: (0, 0, 0)),     # w_x (resident)
            pl.BlockSpec((3, C), lambda i: (0, 0)),           # biases
        ],
        out_specs=pl.BlockSpec((tile, C), lambda i: (i, 0)),
        compiler_params=pltpu.CompilerParams(
            dimension_semantics=("parallel",),
            vmem_limit_bytes=_VMEM_LIMIT_BYTES),
    )(h, x, params["w_h"], params["w_x"], params["b"])


# ----------------------------------------------------------------------------
# Glue helpers (plain JAX / numpy)
# ----------------------------------------------------------------------------
def sparse_to_dense_channel(coords, values, dim_list, c, default_val):
    """coords: (N, 3) int, values: (N, c) -> dense (X, Y, Z, c)."""
    dense = jnp.full((dim_list[0], dim_list[1], dim_list[2], c),
                     float(default_val), dtype=jnp.float32)
    if coords.shape[0] > 0:
        dense = dense.at[coords[:, 0], coords[:, 1], coords[:, 2]].set(values)
    return dense


def init_convgru_params(key, ch):
    k = jax.random.split(key, 6)
    s = 1.0 / np.sqrt(2 * ch)
    wz = jax.random.normal(k[0], (2 * ch, ch), jnp.float32) * s
    wr = jax.random.normal(k[1], (2 * ch, ch), jnp.float32) * s
    wq = jax.random.normal(k[2], (2 * ch, ch), jnp.float32) * s
    bz = jax.random.normal(k[3], (1, ch), jnp.float32) * 0.01
    br = jax.random.normal(k[4], (1, ch), jnp.float32) * 0.01
    bq = jax.random.normal(k[5], (1, ch), jnp.float32) * 0.01
    # Per-gate (C, C) weight halves stacked along a leading dim (done once):
    # index 0 -> z, 1 -> r, 2 -> q. bf16 MXU operands; biases stay f32 since
    # they are added after the f32 accumulation.
    w_h = jnp.stack([wz[:ch], wr[:ch], wq[:ch]], axis=0).astype(jnp.bfloat16)
    w_x = jnp.stack([wz[ch:], wr[ch:], wq[ch:]], axis=0).astype(jnp.bfloat16)
    b = jnp.concatenate([bz, br, bq], axis=0)                 # (3, C) f32
    return {"w_h": w_h, "w_x": w_x, "b": b}


# ----------------------------------------------------------------------------
# GRUFusion (gru_fusion path, direct_substitute=False)
# ----------------------------------------------------------------------------
class GRUFusion:
    def __init__(self, cfg, ch_in):
        self.cfg = cfg
        self.ch_in = ch_in
        self.feat_init = 0
        self.n_scales = len(cfg.THRESHOLDS) - 1
        self.scene_name = [None, None, None]
        self.global_origin = [None, None, None]
        # global hidden state per scale: (coords (M,3) int32, feats (M,C) f32)
        self.global_coords = [None, None, None]
        self.global_values = [None, None, None]
        key = jax.random.PRNGKey(0)
        keys = jax.random.split(key, len(ch_in))
        self.fusion_nets = [init_convgru_params(keys[i], ch)
                            for i, ch in enumerate(ch_in)]

    def reset(self, i):
        c = self.ch_in[2 - i] if len(self.ch_in) == 3 else self.ch_in[0]
        self.global_coords[i] = jnp.zeros((0, 3), jnp.int32)
        self.global_values[i] = jnp.zeros((0, c), jnp.float32)

    def convert2dense(self, current_coords, current_values, relative_origin, scale):
        global_coords = self.global_coords[scale]
        global_value = self.global_values[scale]
        dim = (np.array(self.cfg.N_VOX) // (2 ** scale)).astype(np.int32)
        dim_list = dim.tolist()
        ch = self.ch_in[2 - scale]

        global_coords = global_coords - relative_origin[None, :]
        if global_coords.shape[0] > 0:
            valid = jnp.all((global_coords < dim[None, :]) & (global_coords >= 0), axis=-1)
        else:
            valid = jnp.zeros((0,), bool)

        global_volume = sparse_to_dense_channel(
            global_coords[valid], global_value[valid], dim_list, ch, self.feat_init)
        current_volume = sparse_to_dense_channel(
            current_coords, current_values, dim_list, ch, self.feat_init)

        # occupancy reduction over the channel axis -> Pallas kernel
        V = dim_list[0] * dim_list[1] * dim_list[2]
        mask = occupancy_mask(global_volume.reshape(V, ch),
                              current_volume.reshape(V, ch))
        mask_np = np.asarray(mask).reshape(dim_list)   # host sync (torch.nonzero equiv.)
        updated_coords = np.stack(np.nonzero(mask_np), axis=-1).astype(np.int32)
        updated_coords = jnp.asarray(updated_coords)
        return updated_coords, current_volume, global_volume, valid

    def update_map(self, value, coords, valid, relative_origin, scale):
        keep = jnp.logical_not(valid)
        self.global_values[scale] = jnp.concatenate(
            [self.global_values[scale][keep], value], axis=0)
        coords = coords + relative_origin[None, :]
        self.global_coords[scale] = jnp.concatenate(
            [self.global_coords[scale][keep], coords], axis=0)

    def forward(self, coords, values_in, inputs, scale=0):
        batch_size = len(inputs["fragment"])
        interval = 2 ** scale
        values_all = None
        updated_coords_all = None
        coords_np = np.asarray(coords)

        for i in range(batch_size):
            scene = inputs["scene"][i]
            global_origin = inputs["vol_origin"][i]
            origin = inputs["vol_origin_partial"][i]

            if self.scene_name[scale] is None or scene != self.scene_name[scale]:
                self.scene_name[scale] = scene
                self.reset(scale)
                self.global_origin[scale] = global_origin

            voxel_size = self.cfg.VOXEL_SIZE * interval
            relative_origin = jnp.asarray(
                np.floor((np.asarray(origin) - np.asarray(self.global_origin[scale]))
                         / voxel_size)).astype(jnp.int32)

            batch_ind = np.nonzero(coords_np[:, 0] == i)[0]
            if len(batch_ind) == 0:
                continue
            coords_b = jnp.asarray(coords_np[batch_ind, 1:] // interval, dtype=jnp.int32)
            values = values_in[batch_ind]

            updated_coords, current_volume, global_volume, valid = self.convert2dense(
                coords_b, values, relative_origin, scale)

            # TODO(synk): fusing this row gather into the ConvGRU kernel
            # (memory_space=pl.ANY volumes + per-row DMAs / scalar-prefetched
            # flat indices) would remove one (M, C) HBM write+read round trip,
            # but at C=32 a per-row 128-B DMA's descriptor overhead dominates
            # the saved traffic; kept as an XLA gather.
            values = current_volume[updated_coords[:, 0],
                                    updated_coords[:, 1],
                                    updated_coords[:, 2]]
            global_values = global_volume[updated_coords[:, 0],
                                          updated_coords[:, 1],
                                          updated_coords[:, 2]]

            # r_coords (world->aligned-camera transform), kept for semantic
            # faithfulness; unused by the pointwise ConvGRU gates.
            r = updated_coords.astype(jnp.float32).T * voxel_size \
                + jnp.asarray(origin, jnp.float32)[:, None]
            r = jnp.concatenate([r, jnp.ones_like(r[:1])], axis=0)
            w2c = jnp.asarray(inputs["world_to_aligned_camera"][i][:3, :], jnp.float32)
            r = w2c @ r
            r_coords = jnp.concatenate([r, jnp.zeros((1, r.shape[-1]))], axis=0).T
            del r_coords  # pointwise gates do not consume coordinates

            # GRU fusion (hot path) -> Pallas kernel
            values = convgru_fuse(global_values, values, self.fusion_nets[2 - scale])

            self.update_map(values, updated_coords, valid, relative_origin, scale)

            uc = jnp.concatenate(
                [jnp.full_like(updated_coords[:, :1], i), updated_coords * interval],
                axis=1)
            if updated_coords_all is None:
                updated_coords_all, values_all = uc, values
            else:
                updated_coords_all = jnp.concatenate([updated_coords_all, uc], axis=0)
                values_all = jnp.concatenate([values_all, values], axis=0)

        # tsdf/occ targets: inputs has no 'occ_list' -> None (matches reference path)
        return updated_coords_all, values_all, None, None


# ----------------------------------------------------------------------------
# Demo
# ----------------------------------------------------------------------------
if __name__ == "__main__":
    cfg = SimpleNamespace(
        N_VOX=[8, 8, 8],
        VOXEL_SIZE=0.04,
        THRESHOLDS=[0.0, 0.0, 0.0],  # n_scales = 2
    )
    C = 32
    ch_in = [C, C, C]
    fusion = GRUFusion(cfg, ch_in)

    key = jax.random.PRNGKey(0)
    k1, k2 = jax.random.split(key)
    batch_size, n_pts = 2, 200
    scale = 0

    # coords: (N, 4) = (batch_ind, x, y, z)
    xyz = jax.random.randint(k1, (batch_size * n_pts, 3), 0, cfg.N_VOX[0])
    bind = jnp.repeat(jnp.arange(batch_size), n_pts)[:, None]
    coords = jnp.concatenate([bind, xyz], axis=1).astype(jnp.int32)
    values_in = jax.random.normal(k2, (batch_size * n_pts, C), jnp.float32)

    inputs = {
        "fragment": ["frag_0", "frag_1"],
        "scene": ["scene_0", "scene_0"],
        "vol_origin": [np.zeros(3, np.float32), np.zeros(3, np.float32)],
        "vol_origin_partial": [np.zeros(3, np.float32), np.zeros(3, np.float32)],
        "world_to_aligned_camera": [np.eye(4, dtype=np.float32)[:3, :],
                                    np.eye(4, dtype=np.float32)[:3, :]],
    }

    updated_coords_all, values_all, tsdf_t, occ_t = fusion.forward(
        coords, values_in, inputs, scale=scale)
    jax.block_until_ready(values_all)
    jax.block_until_ready(updated_coords_all)
    assert values_all.shape[1] == C
    assert updated_coords_all.shape[0] == values_all.shape[0]
    assert bool(jnp.all(jnp.isfinite(values_all)))
    print("KERNEL_OK")
</pallas_src>

<mosaic_0001>
module attributes {stable_mosaic.version = 11 : i64} {
  func.func @_occ_mask_kernel(%arg0: i32, %arg1: memref<128x128xf32, #tpu.memory_space<vmem>>, %arg2: memref<128x128xf32, #tpu.memory_space<vmem>>, %arg3: memref<128x4xi32, #tpu.memory_space<vmem>>) attributes {dimension_semantics = [#tpu.dimension_semantics<parallel>], iteration_bounds = array<i64: 1>, scalar_prefetch = 0 : i64, scratch_operands = 0 : i64, tpu.core_type = #tpu.core_type<tc>, window_params = [{transform_indices = @transform_0, window_bounds = array<i64: 128, 128>}, {transform_indices = @transform_1, window_bounds = array<i64: 128, 128>}, {transform_indices = @transform_2, window_bounds = array<i64: 128, 4>}]} {
    %c0 = arith.constant 0 : index
    %c0_0 = arith.constant 0 : index
    %0 = vector.load %arg1[%c0, %c0_0] : memref<128x128xf32, #tpu.memory_space<vmem>>, vector<128x128xf32>
    %cst = arith.constant 0.000000e+00 : f32
    %1 = vector.broadcast %cst : f32 to vector<128x128xf32>
    %2 = arith.cmpf one, %0, %1 : vector<128x128xf32>
    %c0_1 = arith.constant 0 : index
    %c0_2 = arith.constant 0 : index
    %3 = vector.load %arg2[%c0_1, %c0_2] : memref<128x128xf32, #tpu.memory_space<vmem>>, vector<128x128xf32>
    %cst_3 = arith.constant 0.000000e+00 : f32
    %4 = vector.broadcast %cst_3 : f32 to vector<128x128xf32>
    %5 = arith.cmpf one, %3, %4 : vector<128x128xf32>
    %6 = arith.ori %2, %5 : vector<128x128xi1>
    %7 = vector.extract_strided_slice %6 {offsets = [0, 0], sizes = [128, 32], strides = [1, 1]} : vector<128x128xi1> to vector<128x32xi1>
    %cst_4 = arith.constant 1.000000e+00 : f32
    %cst_5 = arith.constant 0.000000e+00 : f32
    %8 = vector.broadcast %cst_4 : f32 to vector<128x32xf32>
    %9 = vector.broadcast %cst_5 : f32 to vector<128x32xf32>
    %10 = arith.select %7, %8, %9 : vector<128x32xi1>, vector<128x32xf32>
    %cst_6 = arith.constant dense<0xFF800000> : vector<128xf32>
    %11 = vector.multi_reduction <maximumf>, %10, %cst_6 [1] : vector<128x32xf32> to vector<128xf32>
    %cst_7 = arith.constant 0.000000e+00 : f32
    %12 = vector.broadcast %cst_7 : f32 to vector<128xf32>
    %13 = arith.cmpf ogt, %11, %12 : vector<128xf32>
    %14 = vector.shape_cast %13 : vector<128xi1> to vector<128x1xi1>
    %15 = arith.extui %14 : vector<128x1xi1> to vector<128x1xi32>
    %c0_8 = arith.constant 0 : index
    %c0_9 = arith.constant 0 : index
    %16 = vector.load %arg3[%c0_8, %c0_9] : memref<128x4xi32, #tpu.memory_space<vmem>>, vector<128x1xi32>
    tpu.vector_store %arg3[%c0_8, %c0_9], %15 {strides = array<i32>} : memref<128x4xi32, #tpu.memory_space<vmem>>, vector<128x1xi32>,
    %17 = vector.extract_strided_slice %6 {offsets = [0, 32], sizes = [128, 32], strides = [1, 1]} : vector<128x128xi1> to vector<128x32xi1>
    %cst_10 = arith.constant 1.000000e+00 : f32
    %cst_11 = arith.constant 0.000000e+00 : f32
    %18 = vector.broadcast %cst_10 : f32 to vector<128x32xf32>
    %19 = vector.broadcast %cst_11 : f32 to vector<128x32xf32>
    %20 = arith.select %17, %18, %19 : vector<128x32xi1>, vector<128x32xf32>
    %cst_12 = arith.constant dense<0xFF800000> : vector<128xf32>
    %21 = vector.multi_reduction <maximumf>, %20, %cst_12 [1] : vector<128x32xf32> to vector<128xf32>
    %cst_13 = arith.constant 0.000000e+00 : f32
    %22 = vector.broadcast %cst_13 : f32 to vector<128xf32>
    %23 = arith.cmpf ogt, %21, %22 : vector<128xf32>
    %24 = vector.shape_cast %23 : vector<128xi1> to vector<128x1xi1>
    %25 = arith.extui %24 : vector<128x1xi1> to vector<128x1xi32>
    %c0_14 = arith.constant 0 : index
    %c1 = arith.constant 1 : index
    %26 = vector.load %arg3[%c0_14, %c1] : memref<128x4xi32, #tpu.memory_space<vmem>>, vector<128x1xi32>
    tpu.vector_store %arg3[%c0_14, %c1], %25 {strides = array<i32>} : memref<128x4xi32, #tpu.memory_space<vmem>>, vector<128x1xi32>,
    %27 = vector.extract_strided_slice %6 {offsets = [0, 64], sizes = [128, 32], strides = [1, 1]} : vector<128x128xi1> to vector<128x32xi1>
    %cst_15 = arith.constant 1.000000e+00 : f32
    %cst_16 = arith.constant 0.000000e+00 : f32
    %28 = vector.broadcast %cst_15 : f32 to vector<128x32xf32>
    %29 = vector.broadcast %cst_16 : f32 to vector<128x32xf32>
    %30 = arith.select %27, %28, %29 : vector<128x32xi1>, vector<128x32xf32>
    %cst_17 = arith.constant dense<0xFF800000> : vector<128xf32>
    %31 = vector.multi_reduction <maximumf>, %30, %cst_17 [1] : vector<128x32xf32> to vector<128xf32>
    %cst_18 = arith.constant 0.000000e+00 : f32
    %32 = vector.broadcast %cst_18 : f32 to vector<128xf32>
    %33 = arith.cmpf ogt, %31, %32 : vector<128xf32>
    %34 = vector.shape_cast %33 : vector<128xi1> to vector<128x1xi1>
    %35 = arith.extui %34 : vector<128x1xi1> to vector<128x1xi32>
    %c0_19 = arith.constant 0 : index
    %c2 = arith.constant 2 : index
    %36 = vector.load %arg3[%c0_19, %c2] : memref<128x4xi32, #tpu.memory_space<vmem>>, vector<128x1xi32>
    tpu.vector_store %arg3[%c0_19, %c2], %35 {strides = array<i32>} : memref<128x4xi32, #tpu.memory_space<vmem>>, vector<128x1xi32>,
    %37 = vector.extract_strided_slice %6 {offsets = [0, 96], sizes = [128, 32], strides = [1, 1]} : vector<128x128xi1> to vector<128x32xi1>
    %cst_20 = arith.constant 1.000000e+00 : f32
    %cst_21 = arith.constant 0.000000e+00 : f32
    %38 = vector.broadcast %cst_20 : f32 to vector<128x32xf32>
    %39 = vector.broadcast %cst_21 : f32 to vector<128x32xf32>
    %40 = arith.select %37, %38, %39 : vector<128x32xi1>, vector<128x32xf32>
    %cst_22 = arith.constant dense<0xFF800000> : vector<128xf32>
    %41 = vector.multi_reduction <maximumf>, %40, %cst_22 [1] : vector<128x32xf32> to vector<128xf32>
    %cst_23 = arith.constant 0.000000e+00 : f32
    %42 = vector.broadcast %cst_23 : f32 to vector<128xf32>
    %43 = arith.cmpf ogt, %41, %42 : vector<128xf32>
    %44 = vector.shape_cast %43 : vector<128xi1> to vector<128x1xi1>
    %45 = arith.extui %44 : vector<128x1xi1> to vector<128x1xi32>
    %c0_24 = arith.constant 0 : index
    %c3 = arith.constant 3 : index
    %46 = vector.load %arg3[%c0_24, %c3] : memref<128x4xi32, #tpu.memory_space<vmem>>, vector<128x1xi32>
    tpu.vector_store %arg3[%c0_24, %c3], %45 {strides = array<i32>} : memref<128x4xi32, #tpu.memory_space<vmem>>, vector<128x1xi32>,
    return
  }
  func.func @transform_0(%arg0: i32) -> (i32, i32) {
    %c0_i32 = arith.constant 0 : i32
    %c0_i32_0 = arith.constant 0 : i32
    return %arg0, %c0_i32 : i32, i32
  }
  func.func @transform_1(%arg0: i32) -> (i32, i32) {
    %c0_i32 = arith.constant 0 : i32
    %c0_i32_0 = arith.constant 0 : i32
    return %arg0, %c0_i32 : i32, i32
  }
  func.func @transform_2(%arg0: i32) -> (i32, i32) {
    %c0_i32 = arith.constant 0 : i32
    %c0_i32_0 = arith.constant 0 : i32
    return %arg0, %c0_i32 : i32, i32
  }
}

</mosaic_0001>

<bundles_post_ra>
// kernel: tpu_custom_call.1
= control target key start
LH: loop header
LB: loop body
LE: loop exit
PB: predicated region body
PF: predicated region fallthrough
CT: control target
= control target key end

     0   :  { %7 = vsyncpa [#allocation3], 0  ;;  %s1129_s0 = inlined_call_operand.hbm [shape: f32[128,128], index: 0, kind: input, shape index: {}]   ;;  %s1130_s1 = inlined_call_operand.hbm [shape: f32[128,128], index: 1, kind: input, shape index: {}]   ;;  %s1131_s2 = inlined_call_operand.vmem [shape: s32[128,4], index: 2, kind: output, shape index: {}]  }
   0x1   :  { %8 = vsyncpa [#allocation5], 0  ;;  %s587_s9 = smov [#allocation2]   ;;  %s539_s13 = scalar_lea.hbm %s1129_s0, 2048 }
   0x2   :  { %s14_s10 = sshll.u32 %s587_s9, 4  ;;  %p540_p0 = scmp.ne.s32.totalorder %s1129_s0, %s539_s13  ;;  %s15_s10 = int_to_ptr.vmem [resolvable:$true] %s14_s10 }
   0x3   :  { %p543_p1 = scmp.lt.u32.totalorder %s539_s13, %s1129_s0 }
   0x5   :  { %p545_p2 = pnand %p543_p1, %p540_p0 }
   0x7   :  { %548 = shalt.err (!%p545_p2)
}
   0x8   :  { %s549_s18 = scalar_lea.vmem %s15_s10, 2048  ;;  %p554_p4 = scmp.lt.s32.totalorder %s15_s10, %s15_s10 }
   0x9   :  { %p550_p3 = scmp.ne.s32.totalorder %s15_s10, %s549_s18  ;;  %p555_p5 = scmp.lt.s32.totalorder %s549_s18, %s549_s18 }
   0xb   :  { %p556_p6 = por %p555_p5, %p554_p4 }
   0xd   :  { %p557_p7 = pnand %p556_p6, %p550_p3 }
   0xf   :  { %560 = shalt.err (!%p557_p7)
}
  0x10   :  { %s588_s19 = smov 128   ;;  %s589_s20 = smov 8  }
  0x11   :  { %20 = dma.hbm_to_vmem [thread:$0]  %s1129_s0, 2048, %s15_s10, [#allocation3], %s588_s19, %s588_s19, %s589_s20  }
  0x12   :  { %s590_s23 = smov [#allocation4]   ;;  %s561_s27 = scalar_lea.hbm %s1130_s1, 2048 }
  0x13   :  { %s26_s24 = sshll.u32 %s590_s23, 4  ;;  %p562_p8 = scmp.ne.s32.totalorder %s1130_s1, %s561_s27  ;;  %s27_s24 = int_to_ptr.vmem [resolvable:$true] %s26_s24 }
  0x14   :  { %p565_p9 = scmp.lt.u32.totalorder %s561_s27, %s1130_s1 }
  0x16   :  { %p567_p10 = pnand %p565_p9, %p562_p8 }
  0x18   :  { %570 = shalt.err (!%p567_p10)
}
  0x19   :  { %s571_s4 = scalar_lea.vmem %s27_s24, 2048  ;;  %p576_p12 = scmp.lt.s32.totalorder %s27_s24, %s27_s24 }
  0x1a   :  { %p572_p11 = scmp.ne.s32.totalorder %s27_s24, %s571_s4  ;;  %p577_p13 = scmp.lt.s32.totalorder %s571_s4, %s571_s4 }
  0x1c   :  { %p578_p0 = por %p577_p13, %p576_p12 }
  0x1e   :  { %p579_p1 = pnand %p578_p0, %p572_p11 }
  0x20   :  { %582 = shalt.err (!%p579_p1)
}
  0x21   :  { %32 = dma.hbm_to_vmem [thread:$0]  %s1130_s1, 2048, %s27_s24, [#allocation5], %s588_s19, %s588_s19, %s589_s20  }
  0x22   :  { %583 = dma.done.wait [#allocation3], 2048  }
  0x23   :  { %584 = vsyncadd [#allocation3], 4294965248 }
  0x24   :  { %585 = dma.done.wait [#allocation5], 2048  }
  0x25   :  { %586 = vsyncadd [#allocation5], 4294965248  ;;  %v41_v0 = vld [vmem:[#allocation2 + $0x10] sm:$0xff]  ;;  %vm135_vm0 = vcmask 261120   ;;  %v39_v2 = vld [vmem:[#allocation2] sm:$0xff]  ;;  %v591_v8 = vmov 0.0  }
  0x26   :  { %v73_v1 = vld [vmem:[#allocation4 + $0x10] sm:$0xff]  ;;  %vm57_vm1 = vcmp.ne.f32.partialorder %v41_v0, 0.0  ;;  %vm55_vm3 = vcmp.ne.f32.partialorder %v39_v2, 0.0  ;;  %v71_v3 = vld [vmem:[#allocation4] sm:$0xff]  ;;  %v42_v4 = vld [vmem:[#allocation2 + $0x18] sm:$0xff] }
  0x27   :  { %vm89_vm2 = vcmp.ne.f32.partialorder %v73_v1, 0.0  ;;  %v74_v5 = vld [vmem:[#allocation4 + $0x18] sm:$0xff]  ;;  %vm87_vm5 = vcmp.ne.f32.partialorder %v71_v3, 0.0  ;;  %vm58_vm6 = vcmp.ne.f32.partialorder %v42_v4, 0.0  ;;  %v40_v6 = vld [vmem:[#allocation2 + $0x8] sm:$0xff]  ;;  %v43_v14 = vld [vmem:[#allocation2 + $0x20] sm:$0xff] }
  0x28   :  { %vm105_vm4 = vmor %vm57_vm1, %vm89_vm2  ;;  %vm90_vm7 = vcmp.ne.f32.partialorder %v74_v5, 0.0  ;;  %v72_v7 = vld [vmem:[#allocation4 + $0x8] sm:$0xff]  ;;  %vm56_vm9 = vcmp.ne.f32.partialorder %v40_v6, 0.0  ;;  %v75_v15 = vld [vmem:[#allocation4 + $0x20] sm:$0xff]  ;;  %vm59_vm15 = vcmp.ne.f32.partialorder %v43_v14, 0.0 }
  0x29   :  { %v633_v9 = vsel %vm105_vm4, 1.0, %v591_v8  ;;  %vm103_vm8 = vmor %vm55_vm3, %vm87_vm5  ;;  %vm88_vm10 = vcmp.ne.f32.partialorder %v72_v7, 0.0  ;;  %v44_v10 = vld [vmem:[#allocation2 + $0x28] sm:$0xff]  ;;  %vm91_vm1 = vcmp.ne.f32.partialorder %v75_v15, 0.0  ;;  %v46_v18 = vld [vmem:[#allocation2 + $0x38] sm:$0xff] }
  0x2a   :  { %v76_v11 = vld [vmem:[#allocation4 + $0x28] sm:$0xff]  ;;  %v142_v12 = vsel %vm135_vm0, %v633_v9, -inf  ;;  %v638_v13 = vsel %vm103_vm8, 1.0, %v591_v8  ;;  %vm106_vm11 = vmor %vm58_vm6, %vm90_vm7  ;;  %vm60_vm12 = vcmp.ne.f32.partialorder %v44_v10, 0.0  ;;  %v78_v19 = vld [vmem:[#allocation4 + $0x38] sm:$0xff]  ;;  %vm62_vm3 = vcmp.ne.f32.partialorder %v46_v18, 0.0 }
  0x2b   :  { %vm92_vm13 = vcmp.ne.f32.partialorder %v76_v11, 0.0  ;;  %143 = vmax.xlane.f32.xlu1 %v142_v12  ;;  %v136_v16 = vsel %vm135_vm0, %v638_v13, -inf  ;;  %v643_v17 = vsel %vm106_vm11, 1.0, %v591_v8  ;;  %vm104_vm14 = vmor %vm56_vm9, %vm88_vm10  ;;  %vm94_vm4 = vcmp.ne.f32.partialorder %v78_v19, 0.0  ;;  %v45_v22 = vld [vmem:[#allocation2 + $0x30] sm:$0xff]  ;;  %v48_v26 = vld [vmem:[#allocation2 + $0x48] sm:$0xff] }
  0x2c   :  { %137 = vmax.xlane.f32.xlu0 %v136_v16  ;;  %v145_v20 = vsel %vm135_vm0, %v643_v17, -inf  ;;  %v648_v21 = vsel %vm104_vm14, 1.0, %v591_v8  ;;  %vm108_vm2 = vmor %vm60_vm12, %vm92_vm13  ;;  %v77_v23 = vld [vmem:[#allocation4 + $0x30] sm:$0xff]  ;;  %vm61_vm6 = vcmp.ne.f32.partialorder %v45_v22, 0.0  ;;  %v80_v27 = vld [vmem:[#allocation4 + $0x48] sm:$0xff]  ;;  %vm64_vm10 = vcmp.ne.f32.partialorder %v48_v26, 0.0 }
  0x2d   :  { %v139_v24 = vsel %vm135_vm0, %v648_v21, -inf  ;;  %v654_v25 = vsel %vm108_vm2, 1.0, %v591_v8  ;;  %vm107_vm5 = vmor %vm59_vm15, %vm91_vm1  ;;  %vm93_vm7 = vcmp.ne.f32.partialorder %v77_v23, 0.0  ;;  %v47_v29 = vld [vmem:[#allocation2 + $0x40] sm:$0xff]  ;;  %vm96_vm11 = vcmp.ne.f32.partialorder %v80_v27, 0.0  ;;  %v50_v32 = vld [vmem:[#allocation2 + $0x58] sm:$0xff] }
  0x2e   :  { %v657_v28 = vsel %vm107_vm5, 1.0, %v591_v8  ;;  %vm110_vm8 = vmor %vm62_vm3, %vm94_vm4  ;;  %v79_v30 = vld [vmem:[#allocation4 + $0x40] sm:$0xff]  ;;  %v151_v31 = vsel %vm135_vm0, %v654_v25, -inf  ;;  %vm63_vm12 = vcmp.ne.f32.partialorder %v47_v29, 0.0  ;;  %v82_v33 = vld [vmem:[#allocation4 + $0x58] sm:$0xff]  ;;  %vm66_vm1 = vcmp.ne.f32.partialorder %v50_v32, 0.0 }
  0x2f   :  { %146 = vmax.xlane.f32.xlu1 %v145_v20  ;;  %vm109_vm9 = vmor %vm61_vm6, %vm93_vm7  ;;  %vm95_vm13 = vcmp.ne.f32.partialorder %v79_v30, 0.0  ;;  %v148_v34 = vsel %vm135_vm0, %v657_v28, -inf  ;;  %v664_v35 = vsel %vm110_vm8, 1.0, %v591_v8  ;;  %v49_v36 = vld [vmem:[#allocation2 + $0x50] sm:$0xff]  ;;  %vm98_vm2 = vcmp.ne.f32.partialorder %v82_v33, 0.0  ;;  %v52_v40 = vld [vmem:[#allocation2 + $0x68] sm:$0xff] }
  0x30   :  { %140 = vmax.xlane.f32.xlu0 %v139_v24  ;;  %v81_v37 = vld [vmem:[#allocation4 + $0x50] sm:$0xff]  ;;  %v667_v38 = vsel %vm109_vm9, 1.0, %v591_v8  ;;  %vm112_vm14 = vmor %vm64_vm10, %vm96_vm11  ;;  %v157_v39 = vsel %vm135_vm0, %v664_v35, -inf  ;;  %vm65_vm3 = vcmp.ne.f32.partialorder %v49_v36, 0.0  ;;  %v84_v41 = vld [vmem:[#allocation4 + $0x68] sm:$0xff]  ;;  %vm68_vm7 = vcmp.ne.f32.partialorder %v52_v40, 0.0 }
  0x31   :  { %vm111_vm15 = vmor %vm63_vm12, %vm95_vm13  ;;  %vm97_vm4 = vcmp.ne.f32.partialorder %v81_v37, 0.0  ;;  %v154_v42 = vsel %vm135_vm0, %v667_v38, -inf  ;;  %v674_v43 = vsel %vm112_vm14, 1.0, %v591_v8  ;;  %v51_v44 = vld [vmem:[#allocation2 + $0x60] sm:$0xff]  ;;  %vm100_vm8 = vcmp.ne.f32.partialorder %v84_v41, 0.0  ;;  %v54_v48 = vld [vmem:[#allocation2 + $0x78] sm:$0xff] }
  0x32   :  { %v83_v45 = vld [vmem:[#allocation4 + $0x60] sm:$0xff]  ;;  %v677_v46 = vsel %vm111_vm15, 1.0, %v591_v8  ;;  %vm114_vm5 = vmor %vm66_vm1, %vm98_vm2  ;;  %v163_v47 = vsel %vm135_vm0, %v674_v43, -inf  ;;  %vm67_vm9 = vcmp.ne.f32.partialorder %v51_v44, 0.0  ;;  %v86_v49 = vld [vmem:[#allocation4 + $0x78] sm:$0xff]  ;;  %vm70_vm13 = vcmp.ne.f32.partialorder %v54_v48, 0.0 }
  0x33   :  { %152 = vmax.xlane.f32.xlu1 %v151_v31  ;;  %vm113_vm6 = vmor %vm65_vm3, %vm97_vm4  ;;  %vm99_vm10 = vcmp.ne.f32.partialorder %v83_v45, 0.0  ;;  %v160_v50 = vsel %vm135_vm0, %v677_v46, -inf  ;;  %v684_v51 = vsel %vm114_vm5, 1.0, %v591_v8  ;;  %v53_v52 = vld [vmem:[#allocation2 + $0x70] sm:$0xff]  ;;  %vm102_vm14 = vcmp.ne.f32.partialorder %v86_v49, 0.0 }
  0x34   :  { %149 = vmax.xlane.f32.xlu0 %v148_v34  ;;  %v85_v53 = vld [vmem:[#allocation4 + $0x70] sm:$0xff]  ;;  %v687_v54 = vsel %vm113_vm6, 1.0, %v591_v8  ;;  %vm116_vm11 = vmor %vm68_vm7, %vm100_vm8  ;;  %v169_v55 = vsel %vm135_vm0, %v684_v51, -inf  ;;  %vm69_vm15 = vcmp.ne.f32.partialorder %v53_v52, 0.0  ;;  %vm233_vm4 = vcmask 523520  }
  0x35   :  { %vm115_vm12 = vmor %vm67_vm9, %vm99_vm10  ;;  %vm101_vm1 = vcmp.ne.f32.partialorder %v85_v53, 0.0  ;;  %v166_v56 = vsel %vm135_vm0, %v687_v54, -inf  ;;  %v694_v57 = vsel %vm116_vm11, 1.0, %v591_v8  ;;  %v237_v1 = vsel %vm233_vm4, %v648_v21, -inf }
  0x36   :  { %v697_v58 = vsel %vm115_vm12, 1.0, %v591_v8  ;;  %vm118_vm2 = vmor %vm70_vm13, %vm102_vm14  ;;  %v175_v59 = vsel %vm135_vm0, %v694_v57, -inf  ;;  %v234_v2 = vsel %vm233_vm4, %v638_v13, -inf  ;;  %v243_v3 = vsel %vm233_vm4, %v643_v17, -inf }
  0x37   :  { %158 = vmax.xlane.f32.xlu1 %v157_v39  ;;  %vm117_vm3 = vmor %vm69_vm15, %vm101_vm1  ;;  %v172_v60 = vsel %vm135_vm0, %v697_v58, -inf  ;;  %v704_v61 = vsel %vm118_vm2, 1.0, %v591_v8  ;;  %v240_v4 = vsel %vm233_vm4, %v633_v9, -inf  ;;  %v249_v5 = vsel %vm233_vm4, %v654_v25, -inf }
  0x38   :  { %155 = vmax.xlane.f32.xlu0 %v154_v42  ;;  %v707_v62 = vsel %vm117_vm3, 1.0, %v591_v8  ;;  %v181_v63 = vsel %vm135_vm0, %v704_v61, -inf  ;;  %v246_v6 = vsel %vm233_vm4, %v657_v28, -inf  ;;  %v255_v7 = vsel %vm233_vm4, %v664_v35, -inf }
  0x39   :  { %v178_v0 = vsel %vm135_vm0, %v707_v62, -inf  ;;  %v252_v8 = vsel %vm233_vm4, %v667_v38, -inf  ;;  %v261_v10 = vsel %vm233_vm4, %v674_v43, -inf  ;;  %v258_v11 = vsel %vm233_vm4, %v677_v46, -inf }
  0x3a   :  { %v267_v12 = vsel %vm233_vm4, %v684_v51, -inf  ;;  %v264_v14 = vsel %vm233_vm4, %v687_v54, -inf  ;;  %v273_v15 = vsel %vm233_vm4, %v694_v57, -inf  ;;  %v270_v16 = vsel %vm233_vm4, %v697_v58, -inf }
  0x3b   :  { %164 = vmax.xlane.f32.xlu1 %v163_v47  ;;  %v279_v18 = vsel %vm233_vm4, %v704_v61, -inf  ;;  %v276_v19 = vsel %vm233_vm4, %v707_v62, -inf  ;;  %vm331_vm0 = vcmask 785920   ;;  %vm429_vm5 = vcmask 1048320  }
  0x3c   :  { %161 = vmax.xlane.f32.xlu0 %v160_v50  ;;  %v335_v20 = vsel %vm331_vm0, %v648_v21, -inf  ;;  %v332_v22 = vsel %vm331_vm0, %v638_v13, -inf  ;;  %v341_v23 = vsel %vm331_vm0, %v643_v17, -inf  ;;  %v338_v24 = vsel %vm331_vm0, %v633_v9, -inf }
  0x3d   :  { %v347_v26 = vsel %vm331_vm0, %v654_v25, -inf  ;;  %v344_v27 = vsel %vm331_vm0, %v657_v28, -inf  ;;  %v353_v29 = vsel %vm331_vm0, %v664_v35, -inf  ;;  %v350_v30 = vsel %vm331_vm0, %v667_v38, -inf }
  0x3e   :  { %v359_v31 = vsel %vm331_vm0, %v674_v43, -inf  ;;  %v356_v32 = vsel %vm331_vm0, %v677_v46, -inf  ;;  %v365_v33 = vsel %vm331_vm0, %v684_v51, -inf  ;;  %v362_v34 = vsel %vm331_vm0, %v687_v54, -inf }
  0x3f   :  { %170 = vmax.xlane.f32.xlu1 %v169_v55  ;;  %v371_v36 = vsel %vm331_vm0, %v694_v57, -inf  ;;  %v368_v37 = vsel %vm331_vm0, %v697_v58, -inf  ;;  %v377_v39 = vsel %vm331_vm0, %v704_v61, -inf  ;;  %v374_v40 = vsel %vm331_vm0, %v707_v62, -inf }
  0x40   :  { %167 = vmax.xlane.f32.xlu0 %v166_v56  ;;  %v433_v41 = vsel %vm429_vm5, %v648_v21, -inf  ;;  %v430_v42 = vsel %vm429_vm5, %v638_v13, -inf  ;;  %v439_v44 = vsel %vm429_vm5, %v643_v17, -inf  ;;  %v436_v45 = vsel %vm429_vm5, %v633_v9, -inf }
  0x41   :  { %v445_v47 = vsel %vm429_vm5, %v654_v25, -inf  ;;  %v442_v48 = vsel %vm429_vm5, %v657_v28, -inf  ;;  %v451_v13 = vsel %vm429_vm5, %v664_v35, -inf  ;;  %v448_v21 = vsel %vm429_vm5, %v667_v38, -inf }
  0x42   :  { %v457_v9 = vsel %vm429_vm5, %v674_v43, -inf  ;;  %v454_v17 = vsel %vm429_vm5, %v677_v46, -inf  ;;  %v463_v25 = vsel %vm429_vm5, %v684_v51, -inf  ;;  %v460_v28 = vsel %vm429_vm5, %v687_v54, -inf }
  0x43   :  { %176 = vmax.xlane.f32.xlu1 %v175_v59  ;;  %v469_v35 = vsel %vm429_vm5, %v694_v57, -inf  ;;  %v466_v38 = vsel %vm429_vm5, %v697_v58, -inf  ;;  %v475_v43 = vsel %vm429_vm5, %v704_v61, -inf  ;;  %v472_v46 = vsel %vm429_vm5, %v707_v62, -inf }
  0x44   :  { %173 = vmax.xlane.f32.xlu0 %v172_v60  ;;  %vm216_vm6 = vcmask 7168   ;;  %v592_v51 = vmov 0  }
  0x47   :  { %182 = vmax.xlane.f32.xlu1 %v181_v63 }
  0x48   :  { %179 = vmax.xlane.f32.xlu0 %v178_v0 }
  0x4b   :  { %238 = vmax.xlane.f32.xlu1 %v237_v1 }
  0x4c   :  { %235 = vmax.xlane.f32.xlu0 %v234_v2 }
  0x4f   :  { %244 = vmax.xlane.f32.xlu1 %v243_v3 }
  0x50   :  { %241 = vmax.xlane.f32.xlu0 %v240_v4 }
  0x53   :  { %250 = vmax.xlane.f32.xlu1 %v249_v5 }
  0x54   :  { %247 = vmax.xlane.f32.xlu0 %v246_v6 }
  0x57   :  { %256 = vmax.xlane.f32.xlu1 %v255_v7 }
  0x58   :  { %253 = vmax.xlane.f32.xlu0 %v252_v8 }
  0x5b   :  { %262 = vmax.xlane.f32.xlu1 %v261_v10 }
  0x5c   :  { %259 = vmax.xlane.f32.xlu0 %v258_v11 }
  0x5f   :  { %268 = vmax.xlane.f32.xlu1 %v267_v12 }
  0x60   :  { %265 = vmax.xlane.f32.xlu0 %v264_v14 }
  0x63   :  { %274 = vmax.xlane.f32.xlu1 %v273_v15 }
  0x64   :  { %271 = vmax.xlane.f32.xlu0 %v270_v16 }
  0x67   :  { %280 = vmax.xlane.f32.xlu1 %v279_v18 }
  0x68   :  { %277 = vmax.xlane.f32.xlu0 %v276_v19 }
  0x6b   :  { %336 = vmax.xlane.f32.xlu1 %v335_v20 }
  0x6c   :  { %333 = vmax.xlane.f32.xlu0 %v332_v22 }
  0x6f   :  { %342 = vmax.xlane.f32.xlu1 %v341_v23 }
  0x70   :  { %339 = vmax.xlane.f32.xlu0 %v338_v24 }
  0x73   :  { %348 = vmax.xlane.f32.xlu1 %v347_v26 }
  0x74   :  { %345 = vmax.xlane.f32.xlu0 %v344_v27 }
  0x77   :  { %354 = vmax.xlane.f32.xlu1 %v353_v29 }
  0x78   :  { %351 = vmax.xlane.f32.xlu0 %v350_v30 }
  0x7b   :  { %360 = vmax.xlane.f32.xlu1 %v359_v31 }
  0x7c   :  { %357 = vmax.xlane.f32.xlu0 %v356_v32 }
  0x7f   :  { %366 = vmax.xlane.f32.xlu1 %v365_v33 }
  0x80   :  { %363 = vmax.xlane.f32.xlu0 %v362_v34 }
  0x83   :  { %372 = vmax.xlane.f32.xlu1 %v371_v36 }
  0x84   :  { %369 = vmax.xlane.f32.xlu0 %v368_v37 }
  0x87   :  { %378 = vmax.xlane.f32.xlu1 %v377_v39 }
  0x88   :  { %375 = vmax.xlane.f32.xlu0 %v374_v40 }
  0x8b   :  { %434 = vmax.xlane.f32.xlu1 %v433_v41 }
  0x8c   :  { %431 = vmax.xlane.f32.xlu0 %v430_v42 }
  0x8f   :  { %440 = vmax.xlane.f32.xlu1 %v439_v44 }
  0x90   :  { %437 = vmax.xlane.f32.xlu0 %v436_v45 }
  0x93   :  { %446 = vmax.xlane.f32.xlu1 %v445_v47 }
  0x94   :  { %443 = vmax.xlane.f32.xlu0 %v442_v48 }
  0x97   :  { %452 = vmax.xlane.f32.xlu1 %v451_v13 }
  0x98   :  { %449 = vmax.xlane.f32.xlu0 %v448_v21 }
  0x9b   :  { %458 = vmax.xlane.f32.xlu1 %v457_v9 }
  0x9c   :  { %455 = vmax.xlane.f32.xlu0 %v454_v17 }
  0x9f   :  { %464 = vmax.xlane.f32.xlu1 %v463_v25 }
  0xa0   :  { %461 = vmax.xlane.f32.xlu0 %v460_v28 }
  0xa3   :  { %470 = vmax.xlane.f32.xlu1 %v469_v35 }
  0xa4   :  { %467 = vmax.xlane.f32.xlu0 %v466_v38 }
  0xa7   :  { %476 = vmax.xlane.f32.xlu1 %v475_v43 }
  0xa8   :  { %473 = vmax.xlane.f32.xlu0 %v472_v46 }
  0xb8   :  { %v144_v49 = vpop.xlane.xlu1 %143 }
  0xb9   :  { %vm186_vm7 = vcmp.gt.f32.partialorder %v144_v49, 0.0  ;;  %v138_v50 = vpop.xlane.xlu0 %137 }
  0xba   :  { %v202_v52 = vsel %vm186_vm7, 1, %v592_v51  ;;  %vm184_vm8 = vcmp.gt.f32.partialorder %v138_v50, 0.0 }
  0xbb   :  { %219 = vst.msk [vmem:[%s1131_s2 + $0x10] sm:$0xff] %vm216_vm6, %v202_v52  ;;  %v200_v53 = vsel %vm184_vm8, 1, %v592_v51  ;;  %vm314_vm8 = vcmask 15368  }
  0xbc   :  { %217 = vst.msk [vmem:[%s1131_s2] sm:$0xff] %vm216_vm6, %v200_v53  ;;  %v147_v54 = vpop.xlane.xlu1 %146 }
  0xbd   :  { %vm187_vm9 = vcmp.gt.f32.partialorder %v147_v54, 0.0  ;;  %v141_v55 = vpop.xlane.xlu0 %140 }
  0xbe   :  { %v203_v56 = vsel %vm187_vm9, 1, %v592_v51  ;;  %vm185_vm10 = vcmp.gt.f32.partialorder %v141_v55, 0.0 }
  0xbf   :  { %220 = vst.msk [vmem:[%s1131_s2 + $0x18] sm:$0xff] %vm216_vm6, %v203_v56  ;;  %v201_v57 = vsel %vm185_vm10, 1, %v592_v51 }
  0xc0   :  { %218 = vst.msk [vmem:[%s1131_s2 + $0x8] sm:$0xff] %vm216_vm6, %v201_v57  ;;  %v153_v58 = vpop.xlane.xlu1 %152 }
  0xc1   :  { %vm189_vm11 = vcmp.gt.f32.partialorder %v153_v58, 0.0  ;;  %v150_v59 = vpop.xlane.xlu0 %149 }
  0xc2   :  { %v205_v60 = vsel %vm189_vm11, 1, %v592_v51  ;;  %vm188_vm12 = vcmp.gt.f32.partialorder %v150_v59, 0.0 }
  0xc3   :  { %222 = vst.msk [vmem:[%s1131_s2 + $0x28] sm:$0xff] %vm216_vm6, %v205_v60  ;;  %v204_v61 = vsel %vm188_vm12, 1, %v592_v51 }
  0xc4   :  { %221 = vst.msk [vmem:[%s1131_s2 + $0x20] sm:$0xff] %vm216_vm6, %v204_v61  ;;  %v159_v62 = vpop.xlane.xlu1 %158 }
  0xc5   :  { %vm191_vm13 = vcmp.gt.f32.partialorder %v159_v62, 0.0  ;;  %v156_v63 = vpop.xlane.xlu0 %155 }
  0xc6   :  { %v207_v0 = vsel %vm191_vm13, 1, %v592_v51  ;;  %vm190_vm14 = vcmp.gt.f32.partialorder %v156_v63, 0.0 }
  0xc7   :  { %224 = vst.msk [vmem:[%s1131_s2 + $0x38] sm:$0xff] %vm216_vm6, %v207_v0  ;;  %v206_v1 = vsel %vm190_vm14, 1, %v592_v51 }
  0xc8   :  { %223 = vst.msk [vmem:[%s1131_s2 + $0x30] sm:$0xff] %vm216_vm6, %v206_v1  ;;  %v165_v2 = vpop.xlane.xlu1 %164 }
  0xc9   :  { %vm193_vm15 = vcmp.gt.f32.partialorder %v165_v2, 0.0  ;;  %v162_v3 = vpop.xlane.xlu0 %161 }
  0xca   :  { %v209_v4 = vsel %vm193_vm15, 1, %v592_v51  ;;  %vm192_vm1 = vcmp.gt.f32.partialorder %v162_v3, 0.0 }
  0xcb   :  { %226 = vst.msk [vmem:[%s1131_s2 + $0x48] sm:$0xff] %vm216_vm6, %v209_v4  ;;  %v208_v5 = vsel %vm192_vm1, 1, %v592_v51 }
  0xcc   :  { %225 = vst.msk [vmem:[%s1131_s2 + $0x40] sm:$0xff] %vm216_vm6, %v208_v5  ;;  %v171_v6 = vpop.xlane.xlu1 %170 }
  0xcd   :  { %vm195_vm2 = vcmp.gt.f32.partialorder %v171_v6, 0.0  ;;  %v168_v7 = vpop.xlane.xlu0 %167 }
  0xce   :  { %v211_v8 = vsel %vm195_vm2, 1, %v592_v51  ;;  %vm194_vm3 = vcmp.gt.f32.partialorder %v168_v7, 0.0 }
  0xcf   :  { %228 = vst.msk [vmem:[%s1131_s2 + $0x58] sm:$0xff] %vm216_vm6, %v211_v8  ;;  %v210_v10 = vsel %vm194_vm3, 1, %v592_v51 }
  0xd0   :  { %227 = vst.msk [vmem:[%s1131_s2 + $0x50] sm:$0xff] %vm216_vm6, %v210_v10  ;;  %v177_v11 = vpop.xlane.xlu1 %176 }
  0xd1   :  { %vm197_vm4 = vcmp.gt.f32.partialorder %v177_v11, 0.0  ;;  %v174_v12 = vpop.xlane.xlu0 %173 }
  0xd2   :  { %v213_v14 = vsel %vm197_vm4, 1, %v592_v51  ;;  %vm196_vm0 = vcmp.gt.f32.partialorder %v174_v12, 0.0 }
  0xd3   :  { %230 = vst.msk [vmem:[%s1131_s2 + $0x68] sm:$0xff] %vm216_vm6, %v213_v14  ;;  %v212_v15 = vsel %vm196_vm0, 1, %v592_v51 }
  0xd4   :  { %229 = vst.msk [vmem:[%s1131_s2 + $0x60] sm:$0xff] %vm216_vm6, %v212_v15  ;;  %v183_v16 = vpop.xlane.xlu1 %182 }
  0xd5   :  { %vm199_vm5 = vcmp.gt.f32.partialorder %v183_v16, 0.0  ;;  %v180_v18 = vpop.xlane.xlu0 %179 }
  0xd6   :  { %v215_v19 = vsel %vm199_vm5, 1, %v592_v51  ;;  %vm198_vm7 = vcmp.gt.f32.partialorder %v180_v18, 0.0 }
  0xd7   :  { %232 = vst.msk [vmem:[%s1131_s2 + $0x78] sm:$0xff] %vm216_vm6, %v215_v19  ;;  %v214_v20 = vsel %vm198_vm7, 1, %v592_v51 }
  0xd8   :  { %231 = vst.msk [vmem:[%s1131_s2 + $0x70] sm:$0xff] %vm216_vm6, %v214_v20  ;;  %v239_v22 = vpop.xlane.xlu1 %238 }
  0xd9   :  { %vm283_vm9 = vcmp.gt.f32.partialorder %v239_v22, 0.0  ;;  %v236_v23 = vpop.xlane.xlu0 %235 }
  0xda   :  { %v299_v24 = vsel %vm283_vm9, 1, %v592_v51  ;;  %vm282_vm10 = vcmp.gt.f32.partialorder %v236_v23, 0.0 }
  0xdb   :  { %316 = vst.msk [vmem:[%s1131_s2 + $0x8] sm:$0xff] %vm314_vm8, %v299_v24  ;;  %v298_v26 = vsel %vm282_vm10, 1, %v592_v51  ;;  %vm412_vm10 = vcmask 23568  }
  0xdc   :  { %315 = vst.msk [vmem:[%s1131_s2] sm:$0xff] %vm314_vm8, %v298_v26  ;;  %v245_v27 = vpop.xlane.xlu1 %244 }
  0xdd   :  { %vm285_vm6 = vcmp.gt.f32.partialorder %v245_v27, 0.0  ;;  %v242_v29 = vpop.xlane.xlu0 %241 }
  0xde   :  { %v301_v30 = vsel %vm285_vm6, 1, %v592_v51  ;;  %vm284_vm11 = vcmp.gt.f32.partialorder %v242_v29, 0.0 }
  0xdf   :  { %318 = vst.msk [vmem:[%s1131_s2 + $0x18] sm:$0xff] %vm314_vm8, %v301_v30  ;;  %v300_v31 = vsel %vm284_vm11, 1, %v592_v51 }
  0xe0   :  { %317 = vst.msk [vmem:[%s1131_s2 + $0x10] sm:$0xff] %vm314_vm8, %v300_v31  ;;  %v251_v32 = vpop.xlane.xlu1 %250 }
  0xe1   :  { %vm287_vm12 = vcmp.gt.f32.partialorder %v251_v32, 0.0  ;;  %v248_v33 = vpop.xlane.xlu0 %247 }
  0xe2   :  { %v303_v34 = vsel %vm287_vm12, 1, %v592_v51  ;;  %vm286_vm13 = vcmp.gt.f32.partialorder %v248_v33, 0.0 }
  0xe3   :  { %320 = vst.msk [vmem:[%s1131_s2 + $0x28] sm:$0xff] %vm314_vm8, %v303_v34  ;;  %v302_v36 = vsel %vm286_vm13, 1, %v592_v51 }
  0xe4   :  { %319 = vst.msk [vmem:[%s1131_s2 + $0x20] sm:$0xff] %vm314_vm8, %v302_v36  ;;  %v257_v37 = vpop.xlane.xlu1 %256 }
  0xe5   :  { %vm289_vm14 = vcmp.gt.f32.partialorder %v257_v37, 0.0  ;;  %v254_v39 = vpop.xlane.xlu0 %253 }
  0xe6   :  { %v305_v40 = vsel %vm289_vm14, 1, %v592_v51  ;;  %vm288_vm15 = vcmp.gt.f32.partialorder %v254_v39, 0.0 }
  0xe7   :  { %322 = vst.msk [vmem:[%s1131_s2 + $0x38] sm:$0xff] %vm314_vm8, %v305_v40  ;;  %v304_v41 = vsel %vm288_vm15, 1, %v592_v51 }
  0xe8   :  { %321 = vst.msk [vmem:[%s1131_s2 + $0x30] sm:$0xff] %vm314_vm8, %v304_v41  ;;  %v263_v42 = vpop.xlane.xlu1 %262 }
  0xe9   :  { %vm291_vm1 = vcmp.gt.f32.partialorder %v263_v42, 0.0  ;;  %v260_v44 = vpop.xlane.xlu0 %259 }
  0xea   :  { %v307_v45 = vsel %vm291_vm1, 1, %v592_v51  ;;  %vm290_vm2 = vcmp.gt.f32.partialorder %v260_v44, 0.0 }
  0xeb   :  { %324 = vst.msk [vmem:[%s1131_s2 + $0x48] sm:$0xff] %vm314_vm8, %v307_v45  ;;  %v306_v47 = vsel %vm290_vm2, 1, %v592_v51 }
  0xec   :  { %323 = vst.msk [vmem:[%s1131_s2 + $0x40] sm:$0xff] %vm314_vm8, %v306_v47  ;;  %v269_v48 = vpop.xlane.xlu1 %268 }
  0xed   :  { %vm293_vm3 = vcmp.gt.f32.partialorder %v269_v48, 0.0  ;;  %v266_v13 = vpop.xlane.xlu0 %265 }
  0xee   :  { %v309_v21 = vsel %vm293_vm3, 1, %v592_v51  ;;  %vm292_vm4 = vcmp.gt.f32.partialorder %v266_v13, 0.0 }
  0xef   :  { %326 = vst.msk [vmem:[%s1131_s2 + $0x58] sm:$0xff] %vm314_vm8, %v309_v21  ;;  %v308_v9 = vsel %vm292_vm4, 1, %v592_v51 }
  0xf0   :  { %325 = vst.msk [vmem:[%s1131_s2 + $0x50] sm:$0xff] %vm314_vm8, %v308_v9  ;;  %v275_v17 = vpop.xlane.xlu1 %274 }
  0xf1   :  { %vm295_vm0 = vcmp.gt.f32.partialorder %v275_v17, 0.0  ;;  %v272_v25 = vpop.xlane.xlu0 %271 }
  0xf2   :  { %v311_v28 = vsel %vm295_vm0, 1, %v592_v51  ;;  %vm294_vm5 = vcmp.gt.f32.partialorder %v272_v25, 0.0 }
  0xf3   :  { %328 = vst.msk [vmem:[%s1131_s2 + $0x68] sm:$0xff] %vm314_vm8, %v311_v28  ;;  %v310_v35 = vsel %vm294_vm5, 1, %v592_v51 }
  0xf4   :  { %327 = vst.msk [vmem:[%s1131_s2 + $0x60] sm:$0xff] %vm314_vm8, %v310_v35  ;;  %v281_v38 = vpop.xlane.xlu1 %280 }
  0xf5   :  { %vm297_vm7 = vcmp.gt.f32.partialorder %v281_v38, 0.0  ;;  %v278_v43 = vpop.xlane.xlu0 %277 }
  0xf6   :  { %v313_v46 = vsel %vm297_vm7, 1, %v592_v51  ;;  %vm296_vm9 = vcmp.gt.f32.partialorder %v278_v43, 0.0 }
  0xf7   :  { %330 = vst.msk [vmem:[%s1131_s2 + $0x78] sm:$0xff] %vm314_vm8, %v313_v46  ;;  %v312_v49 = vsel %vm296_vm9, 1, %v592_v51 }
  0xf8   :  { %329 = vst.msk [vmem:[%s1131_s2 + $0x70] sm:$0xff] %vm314_vm8, %v312_v49  ;;  %v337_v50 = vpop.xlane.xlu1 %336 }
  0xf9   :  { %vm381_vm6 = vcmp.gt.f32.partialorder %v337_v50, 0.0  ;;  %v334_v52 = vpop.xlane.xlu0 %333 }
  0xfa   :  { %v397_v53 = vsel %vm381_vm6, 1, %v592_v51  ;;  %vm380_vm11 = vcmp.gt.f32.partialorder %v334_v52, 0.0 }
  0xfb   :  { %414 = vst.msk [vmem:[%s1131_s2 + $0x8] sm:$0xff] %vm412_vm10, %v397_v53  ;;  %v396_v54 = vsel %vm380_vm11, 1, %v592_v51  ;;  %vm510_vm11 = vcmask 31768  }
  0xfc   :  { %413 = vst.msk [vmem:[%s1131_s2] sm:$0xff] %vm412_vm10, %v396_v54  ;;  %v343_v55 = vpop.xlane.xlu1 %342 }
  0xfd   :  { %vm383_vm8 = vcmp.gt.f32.partialorder %v343_v55, 0.0  ;;  %v340_v56 = vpop.xlane.xlu0 %339 }
  0xfe   :  { %v399_v57 = vsel %vm383_vm8, 1, %v592_v51  ;;  %vm382_vm12 = vcmp.gt.f32.partialorder %v340_v56, 0.0 }
  0xff   :  { %416 = vst.msk [vmem:[%s1131_s2 + $0x18] sm:$0xff] %vm412_vm10, %v399_v57  ;;  %v398_v58 = vsel %vm382_vm12, 1, %v592_v51 }
 0x100   :  { %415 = vst.msk [vmem:[%s1131_s2 + $0x10] sm:$0xff] %vm412_vm10, %v398_v58  ;;  %v349_v59 = vpop.xlane.xlu1 %348 }
 0x101   :  { %vm385_vm13 = vcmp.gt.f32.partialorder %v349_v59, 0.0  ;;  %v346_v60 = vpop.xlane.xlu0 %345 }
 0x102   :  { %v401_v61 = vsel %vm385_vm13, 1, %v592_v51  ;;  %vm384_vm14 = vcmp.gt.f32.partialorder %v346_v60, 0.0 }
 0x103   :  { %418 = vst.msk [vmem:[%s1131_s2 + $0x28] sm:$0xff] %vm412_vm10, %v401_v61  ;;  %v400_v62 = vsel %vm384_vm14, 1, %v592_v51 }
 0x104   :  { %417 = vst.msk [vmem:[%s1131_s2 + $0x20] sm:$0xff] %vm412_vm10, %v400_v62  ;;  %v355_v63 = vpop.xlane.xlu1 %354 }
 0x105   :  { %vm387_vm15 = vcmp.gt.f32.partialorder %v355_v63, 0.0  ;;  %v352_v0 = vpop.xlane.xlu0 %351 }
 0x106   :  { %v403_v1 = vsel %vm387_vm15, 1, %v592_v51  ;;  %vm386_vm1 = vcmp.gt.f32.partialorder %v352_v0, 0.0 }
 0x107   :  { %420 = vst.msk [vmem:[%s1131_s2 + $0x38] sm:$0xff] %vm412_vm10, %v403_v1  ;;  %v402_v2 = vsel %vm386_vm1, 1, %v592_v51 }
 0x108   :  { %419 = vst.msk [vmem:[%s1131_s2 + $0x30] sm:$0xff] %vm412_vm10, %v402_v2  ;;  %v361_v3 = vpop.xlane.xlu1 %360 }
 0x109   :  { %vm389_vm2 = vcmp.gt.f32.partialorder %v361_v3, 0.0  ;;  %v358_v4 = vpop.xlane.xlu0 %357 }
 0x10a   :  { %v405_v5 = vsel %vm389_vm2, 1, %v592_v51  ;;  %vm388_vm3 = vcmp.gt.f32.partialorder %v358_v4, 0.0 }
 0x10b   :  { %422 = vst.msk [vmem:[%s1131_s2 + $0x48] sm:$0xff] %vm412_vm10, %v405_v5  ;;  %v404_v6 = vsel %vm388_vm3, 1, %v592_v51 }
 0x10c   :  { %421 = vst.msk [vmem:[%s1131_s2 + $0x40] sm:$0xff] %vm412_vm10, %v404_v6  ;;  %v367_v7 = vpop.xlane.xlu1 %366 }
 0x10d   :  { %vm391_vm4 = vcmp.gt.f32.partialorder %v367_v7, 0.0  ;;  %v364_v8 = vpop.xlane.xlu0 %363 }
 0x10e   :  { %v407_v10 = vsel %vm391_vm4, 1, %v592_v51  ;;  %vm390_vm0 = vcmp.gt.f32.partialorder %v364_v8, 0.0 }
 0x10f   :  { %424 = vst.msk [vmem:[%s1131_s2 + $0x58] sm:$0xff] %vm412_vm10, %v407_v10  ;;  %v406_v11 = vsel %vm390_vm0, 1, %v592_v51 }
 0x110   :  { %423 = vst.msk [vmem:[%s1131_s2 + $0x50] sm:$0xff] %vm412_vm10, %v406_v11  ;;  %v373_v12 = vpop.xlane.xlu1 %372 }
 0x111   :  { %vm393_vm5 = vcmp.gt.f32.partialorder %v373_v12, 0.0  ;;  %v370_v14 = vpop.xlane.xlu0 %369 }
 0x112   :  { %v409_v15 = vsel %vm393_vm5, 1, %v592_v51  ;;  %vm392_vm7 = vcmp.gt.f32.partialorder %v370_v14, 0.0 }
 0x113   :  { %426 = vst.msk [vmem:[%s1131_s2 + $0x68] sm:$0xff] %vm412_vm10, %v409_v15  ;;  %v408_v16 = vsel %vm392_vm7, 1, %v592_v51 }
 0x114   :  { %425 = vst.msk [vmem:[%s1131_s2 + $0x60] sm:$0xff] %vm412_vm10, %v408_v16  ;;  %v379_v18 = vpop.xlane.xlu1 %378 }
 0x115   :  { %vm395_vm9 = vcmp.gt.f32.partialorder %v379_v18, 0.0  ;;  %v376_v19 = vpop.xlane.xlu0 %375 }
 0x116   :  { %v411_v20 = vsel %vm395_vm9, 1, %v592_v51  ;;  %vm394_vm6 = vcmp.gt.f32.partialorder %v376_v19, 0.0 }
 0x117   :  { %428 = vst.msk [vmem:[%s1131_s2 + $0x78] sm:$0xff] %vm412_vm10, %v411_v20  ;;  %v410_v22 = vsel %vm394_vm6, 1, %v592_v51 }
 0x118   :  { %427 = vst.msk [vmem:[%s1131_s2 + $0x70] sm:$0xff] %vm412_vm10, %v410_v22  ;;  %v435_v23 = vpop.xlane.xlu1 %434 }
 0x119   :  { %vm479_vm8 = vcmp.gt.f32.partialorder %v435_v23, 0.0  ;;  %v432_v24 = vpop.xlane.xlu0 %431 }
 0x11a   :  { %v495_v26 = vsel %vm479_vm8, 1, %v592_v51  ;;  %vm478_vm12 = vcmp.gt.f32.partialorder %v432_v24, 0.0 }
 0x11b   :  { %512 = vst.msk [vmem:[%s1131_s2 + $0x8] sm:$0xff] %vm510_vm11, %v495_v26  ;;  %v494_v27 = vsel %vm478_vm12, 1, %v592_v51 }
 0x11c   :  { %511 = vst.msk [vmem:[%s1131_s2] sm:$0xff] %vm510_vm11, %v494_v27  ;;  %v441_v29 = vpop.xlane.xlu1 %440 }
 0x11d   :  { %vm481_vm10 = vcmp.gt.f32.partialorder %v441_v29, 0.0  ;;  %v438_v30 = vpop.xlane.xlu0 %437 }
 0x11e   :  { %v497_v31 = vsel %vm481_vm10, 1, %v592_v51  ;;  %vm480_vm13 = vcmp.gt.f32.partialorder %v438_v30, 0.0 }
 0x11f   :  { %514 = vst.msk [vmem:[%s1131_s2 + $0x18] sm:$0xff] %vm510_vm11, %v497_v31  ;;  %v496_v32 = vsel %vm480_vm13, 1, %v592_v51 }
 0x120   :  { %513 = vst.msk [vmem:[%s1131_s2 + $0x10] sm:$0xff] %vm510_vm11, %v496_v32  ;;  %v447_v33 = vpop.xlane.xlu1 %446 }
 0x121   :  { %vm483_vm14 = vcmp.gt.f32.partialorder %v447_v33, 0.0  ;;  %v444_v34 = vpop.xlane.xlu0 %443 }
 0x122   :  { %v499_v36 = vsel %vm483_vm14, 1, %v592_v51  ;;  %vm482_vm15 = vcmp.gt.f32.partialorder %v444_v34, 0.0 }
 0x123   :  { %516 = vst.msk [vmem:[%s1131_s2 + $0x28] sm:$0xff] %vm510_vm11, %v499_v36  ;;  %v498_v37 = vsel %vm482_vm15, 1, %v592_v51 }
 0x124   :  { %515 = vst.msk [vmem:[%s1131_s2 + $0x20] sm:$0xff] %vm510_vm11, %v498_v37  ;;  %v453_v39 = vpop.xlane.xlu1 %452 }
 0x125   :  { %vm485_vm1 = vcmp.gt.f32.partialorder %v453_v39, 0.0  ;;  %v450_v40 = vpop.xlane.xlu0 %449 }
 0x126   :  { %v501_v41 = vsel %vm485_vm1, 1, %v592_v51  ;;  %vm484_vm2 = vcmp.gt.f32.partialorder %v450_v40, 0.0 }
 0x127   :  { %518 = vst.msk [vmem:[%s1131_s2 + $0x38] sm:$0xff] %vm510_vm11, %v501_v41  ;;  %v500_v42 = vsel %vm484_vm2, 1, %v592_v51 }
 0x128   :  { %517 = vst.msk [vmem:[%s1131_s2 + $0x30] sm:$0xff] %vm510_vm11, %v500_v42  ;;  %v459_v44 = vpop.xlane.xlu1 %458 }
 0x129   :  { %vm487_vm3 = vcmp.gt.f32.partialorder %v459_v44, 0.0  ;;  %v456_v45 = vpop.xlane.xlu0 %455 }
 0x12a   :  { %v503_v47 = vsel %vm487_vm3, 1, %v592_v51  ;;  %vm486_vm4 = vcmp.gt.f32.partialorder %v456_v45, 0.0 }
 0x12b   :  { %520 = vst.msk [vmem:[%s1131_s2 + $0x48] sm:$0xff] %vm510_vm11, %v503_v47  ;;  %v502_v48 = vsel %vm486_vm4, 1, %v592_v51 }
 0x12c   :  { %519 = vst.msk [vmem:[%s1131_s2 + $0x40] sm:$0xff] %vm510_vm11, %v502_v48  ;;  %v465_v13 = vpop.xlane.xlu1 %464 }
 0x12d   :  { %vm489_vm0 = vcmp.gt.f32.partialorder %v465_v13, 0.0  ;;  %v462_v21 = vpop.xlane.xlu0 %461 }
 0x12e   :  { %v505_v9 = vsel %vm489_vm0, 1, %v592_v51  ;;  %vm488_vm5 = vcmp.gt.f32.partialorder %v462_v21, 0.0 }
 0x12f   :  { %522 = vst.msk [vmem:[%s1131_s2 + $0x58] sm:$0xff] %vm510_vm11, %v505_v9  ;;  %v504_v17 = vsel %vm488_vm5, 1, %v592_v51 }
 0x130   :  { %521 = vst.msk [vmem:[%s1131_s2 + $0x50] sm:$0xff] %vm510_vm11, %v504_v17  ;;  %v471_v25 = vpop.xlane.xlu1 %470 }
 0x131   :  { %vm491_vm7 = vcmp.gt.f32.partialorder %v471_v25, 0.0  ;;  %v468_v28 = vpop.xlane.xlu0 %467 }
 0x132   :  { %v507_v35 = vsel %vm491_vm7, 1, %v592_v51  ;;  %vm490_vm9 = vcmp.gt.f32.partialorder %v468_v28, 0.0 }
 0x133   :  { %524 = vst.msk [vmem:[%s1131_s2 + $0x68] sm:$0xff] %vm510_vm11, %v507_v35  ;;  %v506_v38 = vsel %vm490_vm9, 1, %v592_v51 }
 0x134   :  { %523 = vst.msk [vmem:[%s1131_s2 + $0x60] sm:$0xff] %vm510_vm11, %v506_v38  ;;  %v477_v43 = vpop.xlane.xlu1 %476 }
 0x135   :  { %vm493_vm6 = vcmp.gt.f32.partialorder %v477_v43, 0.0  ;;  %v474_v46 = vpop.xlane.xlu0 %473 }
 0x136   :  { %v509_v49 = vsel %vm493_vm6, 1, %v592_v51  ;;  %vm492_vm8 = vcmp.gt.f32.partialorder %v474_v46, 0.0 }
 0x137   :  { %526 = vst.msk [vmem:[%s1131_s2 + $0x78] sm:$0xff] %vm510_vm11, %v509_v49  ;;  %v508_v50 = vsel %vm492_vm8, 1, %v592_v51 }
 0x138   :  { %525 = vst.msk [vmem:[%s1131_s2 + $0x70] sm:$0xff] %vm510_vm11, %v508_v50 }
 0x139   :  { %531 = vsyncpa [#allocation3], 1 }
 0x13a   :  { %532 = vsyncpa [#allocation5], 1 }

</bundles_post_ra>
